<compile_context>
chip_gen: v7x
topology: tpu7x:2x2x1
jax: 0.10.0
libtpu: 0.0.40
codegen_flags: <defaults>
</compile_context>

<pallas_src>
import jax
import jax.numpy as jnp
import numpy as np
from jax.experimental import pallas as pl
from jax.experimental.pallas import tpu as pltpu

D = 300  # feature dim fixed by the module (rst.view(batch, 300))


def _weight_and_sum_kernel(feats_ref, w_ref, b_ref, out_ref):
    # feats_ref: (bt, nt, D) VMEM  -- node-feature tile (bt graphs, nt nodes each)
    # w_ref:     (1, D)      VMEM  -- Linear(300->1) weight, lane-dense
    # b_ref:     (1, 1)      SMEM  -- Linear bias (scalar)
    # out_ref:   (bt, D)     VMEM  -- per-graph pooled output, f32 accumulator
    k = pl.program_id(1)

    @pl.when(k == 0)
    def _():
        out_ref[...] = jnp.zeros_like(out_ref)

    x = feats_ref[...]                       # [bt, nt, D] f32
    wvec = w_ref[...]                        # [1, D]
    bias = b_ref[0, 0]                       # scalar from SMEM

    # Per-node gate: sigmoid(<x, w> + b) -> [bt, nt, 1]  (VPU mul + lane reduce + EUP)
    logits = jnp.sum(x * wvec, axis=-1, keepdims=True) + bias
    gate = jax.nn.sigmoid(logits)

    # Weighted node sum, pure VPU f32 accumulation: [bt, nt, D] -> [bt, D]
    out_ref[...] += jnp.sum(x * gate, axis=1)


def _round_up(x, m):
    return ((x + m - 1) // m) * m


def _pick_tiles(B, N, target_block_bytes=6 * 1024 * 1024):
    """Pick (bt, nt, b_pad, n_pad) for a (bt, nt, D) f32 feats block."""
    rows_budget = max(64, target_block_bytes // (D * 4))      # ~5.2K rows of 300 f32
    n_pad = _round_up(max(N, 1), 8)

    if B <= 8:
        # Tiny batch: one block spans the whole batch (bt == full extent is legal).
        bt, b_pad = B, B
    else:
        fit = rows_budget // n_pad                            # whole graphs per block
        bt = max(8, (min(fit, (B + 1) // 2) // 8) * 8)        # mult of 8, >=2 batch blocks
        nblk = -(-B // bt)
        bt = _round_up(-(-B // nblk), 8)                      # rebalance to cut padding
        b_pad = _round_up(B, bt)

    # Node chunk: as many nodes as the row budget allows given bt graphs per block.
    nt_cap = max(8, (rows_budget // max(bt, 1) // 8) * 8)
    if n_pad <= nt_cap:
        nt = n_pad
    else:
        nt = nt_cap
        n_pad = _round_up(N, nt)

    return bt, nt, b_pad, n_pad


def pool_graph_forward(node_feats, lin_w, lin_b):
    """node_feats: [B, N, D] f32; lin_w: [1, D]; lin_b: [1] -> [B, D]."""
    node_feats = node_feats.astype(jnp.float32)
    B, N, d = node_feats.shape
    assert d == D, f"feature dim must be {D}, got {d}"

    bt, nt, b_pad, n_pad = _pick_tiles(B, N)
    if b_pad != B or n_pad != N:
        # Zero padding is numerically safe: padded nodes contribute sigmoid(b)*0 = 0.
        node_feats = jnp.pad(node_feats, ((0, b_pad - B), (0, n_pad - N), (0, 0)))
    grid = (b_pad // bt, n_pad // nt)

    lin_w2 = lin_w.reshape(1, D).astype(jnp.float32)
    lin_b2 = lin_b.reshape(1, 1).astype(jnp.float32)

    block_bytes = bt * nt * D * 4
    vmem_limit = int(min(40 << 20,
                         max(16 << 20, 2 * block_bytes + 4 * bt * D * 4 + (2 << 20))))

    cost = pl.CostEstimate(
        flops=4 * B * N * D,                       # gate dot + weighted sum
        transcendentals=B * N,                     # sigmoid
        bytes_accessed=B * N * D * 4 + B * D * 4 + D * 4 + 4,
    )

    out = pl.pallas_call(
        _weight_and_sum_kernel,
        out_shape=jax.ShapeDtypeStruct((b_pad, D), jnp.float32),
        grid_spec=pltpu.PrefetchScalarGridSpec(
            num_scalar_prefetch=0,
            grid=grid,
            in_specs=[
                pl.BlockSpec((bt, nt, D), lambda b, k: (b, k, 0)),   # feats tile
                pl.BlockSpec((1, D), lambda b, k: (0, 0)),           # shared weight
                pl.BlockSpec(memory_space=pltpu.MemorySpace.SMEM),   # bias scalar
            ],
            out_specs=pl.BlockSpec((bt, D), lambda b, k: (b, 0)),
        ),
        compiler_params=pltpu.CompilerParams(
            dimension_semantics=("parallel", "arbitrary"),
            vmem_limit_bytes=vmem_limit,
        ),
        cost_estimate=cost,
    )(node_feats, lin_w2, lin_b2)

    return out[:B]


def pool_graph_reference(node_feats, lin_w, lin_b):
    # Pure elementwise f32 reference.
    logits = jnp.sum(node_feats * lin_w[0], axis=-1, keepdims=True) + lin_b[0]
    gate = jax.nn.sigmoid(logits)                                  # [B, N, 1]
    return jnp.sum(node_feats * gate, axis=1)                      # [B, D]


if __name__ == "__main__":
    key = jax.random.PRNGKey(0)
    k_feat, k_w, k_b = jax.random.split(key, 3)

    batch = 2          # g.batch_size
    nodes = 8          # nodes per graph (same for every graph in this synthetic batch)

    node_feats = jax.random.normal(k_feat, (batch, nodes, D), dtype=jnp.float32)

    # nn.Linear(300, 1) params, PyTorch-style uniform init bound
    bound = 1.0 / np.sqrt(D)
    lin_w = jax.random.uniform(k_w, (1, D), jnp.float32, -bound, bound)
    lin_b = jax.random.uniform(k_b, (1,), jnp.float32, -bound, bound)

    out = jax.block_until_ready(pool_graph_forward(node_feats, lin_w, lin_b))
    ref = jax.block_until_ready(pool_graph_reference(node_feats, lin_w, lin_b))

    assert out.shape == (batch, D)
    np.testing.assert_allclose(np.asarray(out), np.asarray(ref), rtol=1e-4, atol=1e-4)

    print("KERNEL_OK")
</pallas_src>

<mosaic_0001>
module attributes {stable_mosaic.version = 11 : i64} {
  func.func @_weight_and_sum_kernel(%arg0: i32, %arg1: i32, %arg2: memref<2x8x300xf32, #tpu.memory_space<vmem>>, %arg3: memref<1x300xf32, #tpu.memory_space<vmem>>, %arg4: memref<1x1xf32, #tpu.memory_space<smem>>, %arg5: memref<2x300xf32, #tpu.memory_space<vmem>>) attributes {dimension_semantics = [#tpu.dimension_semantics<parallel>, #tpu.dimension_semantics<arbitrary>], iteration_bounds = array<i64: 1, 1>, scalar_prefetch = 0 : i64, scratch_operands = 0 : i64, tpu.core_type = #tpu.core_type<tc>, window_params = [{transform_indices = @transform_0, window_bounds = array<i64: 2, 8, 300>}, {pipeline_mode = #tpu.pipeline_mode<synchronous>, transform_indices = @transform_1, window_bounds = array<i64: 1, 300>}, {transform_indices = @transform_2, window_bounds = array<i64: 1, 1>}, {transform_indices = @transform_3, window_bounds = array<i64: 2, 300>}]} {
    %c0_i32 = arith.constant 0 : i32
    %0 = arith.cmpi eq, %arg1, %c0_i32 : i32
    %1 = arith.extui %0 : i1 to i32
    %c0_i32_0 = arith.constant 0 : i32
    %2 = arith.cmpi ne, %1, %c0_i32_0 : i32
    scf.if %2 {
      %cst_13 = arith.constant 0.000000e+00 : f32
      %24 = vector.broadcast %cst_13 : f32 to vector<2x300xf32>
      %c0_14 = arith.constant 0 : index
      %c0_15 = arith.constant 0 : index
      %25 = vector.load %arg5[%c0_14, %c0_15] : memref<2x300xf32, #tpu.memory_space<vmem>>, vector<2x300xf32>
      tpu.vector_store %arg5[%c0_14, %c0_15], %24 {strides = array<i32>} : memref<2x300xf32, #tpu.memory_space<vmem>>, vector<2x300xf32>,
    } else {
    }
    %c0 = arith.constant 0 : index
    %c0_1 = arith.constant 0 : index
    %c0_2 = arith.constant 0 : index
    %3 = vector.load %arg2[%c0, %c0_1, %c0_2] : memref<2x8x300xf32, #tpu.memory_space<vmem>>, vector<2x8x300xf32>
    %c0_3 = arith.constant 0 : index
    %c0_4 = arith.constant 0 : index
    %4 = vector.load %arg3[%c0_3, %c0_4] : memref<1x300xf32, #tpu.memory_space<vmem>>, vector<1x300xf32>
    %c0_5 = arith.constant 0 : index
    %c0_6 = arith.constant 0 : index
    %5 = memref.load %arg4[%c0_5, %c0_6] : memref<1x1xf32, #tpu.memory_space<smem>>
    %6 = vector.shape_cast %4 : vector<1x300xf32> to vector<1x1x300xf32>
    %7 = vector.broadcast %6 : vector<1x1x300xf32> to vector<2x8x300xf32>
    %8 = arith.mulf %3, %7 : vector<2x8x300xf32>
    %cst = arith.constant dense<0.000000e+00> : vector<2x8xf32>
    %9 = vector.multi_reduction <add>, %8, %cst [2] : vector<2x8x300xf32> to vector<2x8xf32>
    %10 = vector.shape_cast %9 : vector<2x8xf32> to vector<2x8x1xf32>
    %11 = vector.broadcast %5 : f32 to vector<2x8x1xf32>
    %12 = arith.addf %10, %11 : vector<2x8x1xf32>
    %13 = arith.negf %12 : vector<2x8x1xf32>
    %14 = math.exp %13 : vector<2x8x1xf32>
    %cst_7 = arith.constant 1.000000e+00 : f32
    %15 = vector.broadcast %cst_7 : f32 to vector<2x8x1xf32>
    %16 = arith.addf %15, %14 : vector<2x8x1xf32>
    %17 = arith.divf %15, %16 : vector<2x8x1xf32>
    %c0_8 = arith.constant 0 : index
    %c0_9 = arith.constant 0 : index
    %18 = vector.load %arg5[%c0_8, %c0_9] : memref<2x300xf32, #tpu.memory_space<vmem>>, vector<2x300xf32>
    %19 = vector.broadcast %17 : vector<2x8x1xf32> to vector<2x8x300xf32>
    %20 = arith.mulf %3, %19 : vector<2x8x300xf32>
    %cst_10 = arith.constant dense<0.000000e+00> : vector<2x300xf32>
    %21 = vector.multi_reduction <add>, %20, %cst_10 [1] : vector<2x8x300xf32> to vector<2x300xf32>
    %22 = arith.addf %18, %21 : vector<2x300xf32>
    %c0_11 = arith.constant 0 : index
    %c0_12 = arith.constant 0 : index
    %23 = vector.load %arg5[%c0_11, %c0_12] : memref<2x300xf32, #tpu.memory_space<vmem>>, vector<2x300xf32>
    tpu.vector_store %arg5[%c0_11, %c0_12], %22 {strides = array<i32>} : memref<2x300xf32, #tpu.memory_space<vmem>>, vector<2x300xf32>,
    return
  }
  func.func @transform_0(%arg0: i32, %arg1: i32) -> (i32, i32, i32) {
    %c0_i32 = arith.constant 0 : i32
    %c0_i32_0 = arith.constant 0 : i32
    return %arg0, %arg1, %c0_i32 : i32, i32, i32
  }
  func.func @transform_1(%arg0: i32, %arg1: i32) -> (i32, i32) {
    %c0_i32 = arith.constant 0 : i32
    %c0_i32_0 = arith.constant 0 : i32
    %c0_i32_1 = arith.constant 0 : i32
    return %c0_i32, %c0_i32_0 : i32, i32
  }
  func.func @transform_2(%arg0: i32, %arg1: i32) -> (i32, i32) {
    %c0_i32 = arith.constant 0 : i32
    %c0_i32_0 = arith.constant 0 : i32
    %c0_i32_1 = arith.constant 0 : i32
    return %c0_i32, %c0_i32_0 : i32, i32
  }
  func.func @transform_3(%arg0: i32, %arg1: i32) -> (i32, i32) {
    %c0_i32 = arith.constant 0 : i32
    %c0_i32_0 = arith.constant 0 : i32
    return %arg0, %c0_i32 : i32, i32
  }
}

</mosaic_0001>

<bundles_post_ra>
// kernel: tpu_custom_call.1
= control target key start
LH: loop header
LB: loop body
LE: loop exit
PB: predicated region body
PF: predicated region fallthrough
CT: control target
= control target key end

     0   :  { %9 = vsyncpa [#allocation4], 0  ;;  %s353_s0 = inlined_call_operand.hbm [shape: f32[2,8,300], index: 0, kind: input, shape index: {}]   ;;  %s354_s1 = inlined_call_operand.vmem [shape: f32[1,300], index: 1, kind: input, shape index: {}]   ;;  %s355_s2 = inlined_call_operand.<no memory space> [shape: f32[1,1], index: 2, kind: input, shape index: {}]   ;;  %s356_s3 = inlined_call_operand.hbm [shape: f32[2,300], index: 3, kind: output, shape index: {}]  }
   0x1   :  { %10 = vsyncpa [#allocation5], 0  ;;  %s279_s12 = smov [#allocation3]   ;;  %s231_s16 = scalar_lea.hbm %s353_s0, 768 }
   0x2   :  { %s16_s13 = sshll.u32 %s279_s12, 4  ;;  %p232_p0 = scmp.ne.s32.totalorder %s353_s0, %s231_s16  ;;  %s17_s13 = int_to_ptr.vmem [resolvable:$true] %s16_s13 }
   0x3   :  { %p235_p1 = scmp.lt.u32.totalorder %s231_s16, %s353_s0 }
   0x5   :  { %p237_p2 = pnand %p235_p1, %p232_p0 }
   0x7   :  { %240 = shalt.err (!%p237_p2)
}
   0x8   :  { %s241_s21 = scalar_lea.vmem %s17_s13, 768  ;;  %p246_p4 = scmp.lt.s32.totalorder %s17_s13, %s17_s13 }
   0x9   :  { %p242_p3 = scmp.ne.s32.totalorder %s17_s13, %s241_s21  ;;  %p247_p5 = scmp.lt.s32.totalorder %s241_s21, %s241_s21 }
   0xb   :  { %p248_p6 = por %p247_p5, %p246_p4 }
   0xd   :  { %p249_p7 = pnand %p248_p6, %p242_p3 }
   0xf   :  { %252 = shalt.err (!%p249_p7)
}
  0x10   :  { %s280_s22 = smov 384   ;;  %s281_s23 = smov 24  }
  0x11   :  { %22 = dma.hbm_to_vmem [thread:$0]  %s353_s0, 768, %s17_s13, [#allocation4], %s280_s22, %s280_s22, %s281_s23  }
  0x12   :  { %275 = dma.done.wait [#allocation4], 768  }
  0x13   :  { %276 = vsyncadd [#allocation4], 4294966528  ;;  %v49_v0 = vlaneseq  ;;  %v43_v5 = vld [vmem:[#allocation3 + $0x18] sm:$0xff]  ;;  %v44_v6 = vld [vmem:[#allocation3 + $0x20] sm:$0xff]  ;;  %vm71_vm0 = vcmask 359424   ;;  %vm34_vm1 = vcmask 1041408   ;;  %v81_v29 = vstv %s355_s2 }
  0x14   :  { %v45_v7 = vld [vmem:[#allocation3 + $0x28] sm:$0xff]  ;;  %v46_v8 = vld [vmem:[%s354_s1] sm:$0x7]  ;;  %v42_v14 = vld [vmem:[#allocation3 + $0x10] sm:$0xff]  ;;  %vm35_vm2 = vcmask 1043458   ;;  %vm37_vm3 = vcmask 357380  }
  0x15   :  { %v317_v1 = vshrl.u32 %v49_v0, 7  ;;  %v40_v9 = vld [vmem:[#allocation3] sm:$0xff]  ;;  %v41_v13 = vld [vmem:[#allocation3 + $0x8] sm:$0xff]  ;;  %vm36_vm4 = vmor %vm35_vm2, %vm34_vm1  ;;  %v282_v28 = vmov 0.0   ;;  %v283_v48 = vmov 1983009808  }
  0x16   :  { %vm327_vm5 = vmor %vm37_vm3, %vm36_vm4  ;;  %v149_v49 = vunpack.c.l.s4 %v283_v48  ;;  %vm184_vm6 = vcmask 1041409   ;;  %vm186_vm7 = vcmask 1043459   ;;  %vm188_vm8 = vcmask 1045509   ;;  %s284_s2 = smov [#allocation6]  }
  0x17   :  { %v51_v2 = vsub.s32 0, %v317_v1  ;;  %v55_v3 = vsub.s32 1, %v317_v1  ;;  %v59_v4 = vsub.s32 2, %v317_v1  ;;  %39 = vst.msk [vmem:[#allocation6] sm:$0x3f] %vm327_vm5, %v282_v28  ;;  %vm190_vm9 = vcmask 1047559  }
  0x18   :  { %v150_v61 = vunpack.c.0.s8 %v149_v49  ;;  %s206_s28 = sshll.u32 %s284_s2, 4  ;;  %s207_s28 = int_to_ptr.vmem [resolvable:$true] %s206_s28 }
  0x19   :  { %v52_v10 = vrot.slane %v46_v8, %v51_v2  ;;  %v56_v11 = vrot.slane %v46_v8, %v55_v3  ;;  %v60_v12 = vrot.slane %v46_v8, %v59_v4  ;;  %s253_s29 = scalar_lea.vmem %s207_s28, 96  ;;  %p258_p9 = scmp.lt.s32.totalorder %s207_s28, %s207_s28 }
  0x1a   :  { %p254_p8 = scmp.ne.s32.totalorder %s207_s28, %s253_s29  ;;  %p259_p10 = scmp.lt.s32.totalorder %s253_s29, %s253_s29 }
  0x1b   :  { %v67_v15 = vmul.f32 %v52_v10, %v43_v5  ;;  %v68_v16 = vmul.f32 %v56_v11, %v44_v6  ;;  %v69_v17 = vmul.f32 %v60_v12, %v45_v7  ;;  %v64_v18 = vmul.f32 %v52_v10, %v40_v9 }
  0x1c   :  { %v65_v19 = vmul.f32 %v56_v11, %v41_v13  ;;  %v66_v20 = vmul.f32 %v60_v12, %v42_v14  ;;  %v153_v11 = vsub.s32 %v150_v61, %v317_v1  ;;  %p260_p11 = por %p259_p10, %p258_p9 }
  0x1d   :  { %v76_v21 = vadd.f32 %v68_v16, %v67_v15  ;;  %v77_v22 = vsel %vm71_vm0, %v69_v17, 0.0 }
  0x1e   :  { %v70_v23 = vadd.f32 %v65_v19, %v64_v18  ;;  %v72_v24 = vsel %vm71_vm0, %v66_v20, 0.0  ;;  %p261_p12 = pnand %p260_p11, %p254_p8 }
  0x1f   :  { %v78_v25 = vadd.f32 %v77_v22, %v76_v21 }
  0x20   :  { %v73_v26 = vadd.f32 %v72_v24, %v70_v23 }
  0x21   :  { %79 = vadd.xlane.f32.xlu0 %v78_v25 }
  0x25   :  { %74 = vadd.xlane.f32.xlu0 %v73_v26 }
  0xae   :  { %v80_v30 = vpop.xlane.xlu0 %79 }
  0xaf   :  { %v83_v31 = vadd.f32 %v81_v29, %v80_v30 }
  0xb1   :  { %v216_v32 = vmul.f32 -1.442695, %v83_v31 }
  0xb2   :  { %v75_v33 = vpop.xlane.xlu0 %74 }
  0xb3   :  { %223 = vpow2.f32 %v216_v32  ;;  %v82_v34 = vadd.f32 %v81_v29, %v75_v33 }
  0xb5   :  { %v215_v35 = vmul.f32 -1.442695, %v82_v34 }
  0xb7   :  { %225 = vpow2.f32 %v215_v35 }
  0xbd   :  { %v224_v36 = vpop.eup %223 }
  0xbe   :  { %v91_v37 = vadd.f32 1.0, %v224_v36 }
  0xc0   :  { %227 = vrcp.f32 %v91_v37  ;;  %v96_v37 = vld [vmem:[#allocation6] sm:$0x3f] }
  0xc1   :  { %v226_v38 = vpop.eup %225 }
  0xc2   :  { %v90_v39 = vadd.f32 1.0, %v226_v38 }
  0xc4   :  { %229 = vrcp.f32 %v90_v39 }
  0xca   :  { %v228_v40 = vpop.eup %227 }
  0xcb   :  { %v100_v41 = vmul.f32 %v228_v40, %v43_v5  ;;  %v101_v42 = vmul.f32 %v228_v40, %v44_v6  ;;  %v102_v43 = vmul.f32 %v228_v40, %v45_v7 }
  0xcd   :  { %v122_v44 = vrot.slane %v100_v41, 4  ;;  %v128_v45 = vrot.slane %v101_v42, 4  ;;  %v134_v46 = vsel %vm71_vm0, %v102_v43, 0.0 }
  0xce   :  { %v230_v47 = vpop.eup %229  ;;  %v135_v50 = vrot.slane %v134_v46, 4 }
  0xcf   :  { %v97_v51 = vmul.f32 %v230_v47, %v40_v9  ;;  %v98_v52 = vmul.f32 %v230_v47, %v41_v13  ;;  %v99_v53 = vmul.f32 %v230_v47, %v42_v14  ;;  %v123_v54 = vadd.f32 %v122_v44, %v100_v41 }
  0xd0   :  { %v129_v55 = vadd.f32 %v128_v45, %v101_v42  ;;  %v136_v56 = vadd.f32 %v135_v50, %v134_v46 }
  0xd1   :  { %v103_v57 = vrot.slane %v97_v51, 4  ;;  %v109_v58 = vrot.slane %v98_v52, 4  ;;  %v115_v59 = vsel %vm71_vm0, %v99_v53, 0.0  ;;  %v124_v60 = vrot.slane %v123_v54, 2 }
  0xd2   :  { %v116_v62 = vrot.slane %v115_v59, 4  ;;  %v130_v63 = vrot.slane %v129_v55, 2  ;;  %v137_v0 = vrot.slane %v136_v56, 2 }
  0xd3   :  { %v104_v2 = vadd.f32 %v103_v57, %v97_v51  ;;  %v110_v3 = vadd.f32 %v109_v58, %v98_v52  ;;  %v125_v4 = vadd.f32 %v124_v60, %v123_v54 }
  0xd4   :  { %v117_v5 = vadd.f32 %v116_v62, %v115_v59  ;;  %v131_v6 = vadd.f32 %v130_v63, %v129_v55  ;;  %v138_v7 = vadd.f32 %v137_v0, %v136_v56 }
  0xd5   :  { %v105_v8 = vrot.slane %v104_v2, 2  ;;  %v111_v9 = vrot.slane %v110_v3, 2  ;;  %v126_v10 = vrot.slane %v125_v4, 1 }
  0xd6   :  { %v118_v12 = vrot.slane %v117_v5, 2  ;;  %v132_v13 = vrot.slane %v131_v6, 1  ;;  %v139_v14 = vrot.slane %v138_v7, 1 }
  0xd7   :  { %v106_v15 = vadd.f32 %v105_v8, %v104_v2  ;;  %v112_v16 = vadd.f32 %v111_v9, %v110_v3  ;;  %v127_v17 = vadd.f32 %v126_v10, %v125_v4 }
  0xd8   :  { %v119_v18 = vadd.f32 %v118_v12, %v117_v5  ;;  %v133_v19 = vadd.f32 %v132_v13, %v131_v6  ;;  %v140_v20 = vadd.f32 %v139_v14, %v138_v7 }
  0xd9   :  { %v107_v21 = vrot.slane %v106_v15, 1  ;;  %v113_v22 = vrot.slane %v112_v16, 1 }
  0xda   :  { %v120_v23 = vrot.slane %v119_v18, 1  ;;  %v163_v24 = vcombine.low %v127_v17, %v133_v19  ;;  %v177_v25 = vrot.slane %v140_v20, %v153_v11 }
  0xdb   :  { %v108_v26 = vadd.f32 %v107_v21, %v106_v15  ;;  %v114_v28 = vadd.f32 %v113_v22, %v112_v16 }
  0xdc   :  { %v121_v29 = vadd.f32 %v120_v23, %v119_v18  ;;  %v170_v30 = vrot.slane %v163_v24, %v153_v11 }
  0xdd   :  { %v147_v31 = vcombine.low %v108_v26, %v114_v28 }
  0xde   :  { %v161_v1 = vrot.slane %v121_v29, %v153_v11  ;;  %v178_v32 = vcombine.low %v170_v30, %v177_v25 }
  0xdf   :  { %v154_v33 = vrot.slane %v147_v31, %v153_v11 }
  0xe0   :  { %v183_v35 = vrot.slane %v178_v32, 7 }
  0xe1   :  { %v162_v34 = vcombine.low %v154_v33, %v161_v1 }
  0xe3   :  { %v185_v36 = vsel %vm184_vm6, %v183_v35, %v162_v34 }
  0xe4   :  { %v187_v38 = vsel %vm186_vm7, %v183_v35, %v185_v36 }
  0xe5   :  { %v189_v39 = vsel %vm188_vm8, %v183_v35, %v187_v38 }
  0xe6   :  { %v191_v40 = vsel %vm190_vm9, %v183_v35, %v189_v39 }
  0xe7   :  { %v193_v41 = vadd.f32 %v191_v40, %v96_v37 }
  0xe9   :  { %199 = vst.msk [vmem:[#allocation6] sm:$0x3f] %vm327_vm5, %v193_v41 }
  0xea   :  { %264 = shalt.err (!%p261_p12)
}
  0xeb   :  { %s265_s5 = scalar_lea.hbm %s356_s3, 96 }
  0xec   :  { %p266_p13 = scmp.ne.s32.totalorder %s356_s3, %s265_s5  ;;  %p269_p0 = scmp.lt.u32.totalorder %s265_s5, %s356_s3 }
  0xee   :  { %p271_p1 = pnand %p269_p0, %p266_p13 }
  0xf0   :  { %274 = shalt.err (!%p271_p1)
}
  0xf1   :  { %209 = dma.vmem_to_hbm [thread:$0]  %s207_s28, 96, %s356_s3, [#allocation5]  }
  0xf2   :  { %277 = dma.done.wait [#allocation5], 96  }
  0xf3   :  { %278 = vsyncadd [#allocation5], 4294967200 }
  0xf4   :  { %213 = vsyncpa [#allocation4], 1 }
  0xf5   :  { %214 = vsyncpa [#allocation5], 1 }

</bundles_post_ra>
